<compile_context>
chip_gen: v5e
topology: v5e:2x2
jax: 0.10.0
libtpu: 0.0.40
codegen_flags: <defaults>
</compile_context>

<pallas_src>
import numpy as np
import jax
import jax.numpy as jnp
from jax import lax
from jax.experimental import pallas as pl
from jax.experimental.pallas import tpu as pltpu


def _round_up(x, m):
    return ((x + m - 1) // m) * m


# ------------------------------- Pallas kernel -------------------------------

def embedder_kernel(idx_ref, table_ref, out_ref):
    """One block of the fused embedding gather via a one-hot MXU matmul.

    idx_ref:   (bN, 1)  int32   flat row indices into the stacked table
    table_ref: (Rp, Hp) float32 stacked + zero-padded category tables (resident)
    out_ref:   (bN, Hp) float32 gathered rows (lane-dense, multiple of 128)
    """
    b_n = out_ref.shape[0]
    r_p = table_ref.shape[0]

    idx = idx_ref[...]                                            # (bN, 1)
    one_hot = (lax.broadcasted_iota(jnp.int32, (b_n, r_p), 1) == idx)
    one_hot = one_hot.astype(jnp.float32)                         # exact 0/1

    # Exact row selection on the MXU: one non-zero per lhs row, HIGHEST keeps
    # the f32 table values un-truncated, f32 accumulation.
    out_ref[...] = jnp.dot(
        one_hot,
        table_ref[...],
        preferred_element_type=jnp.float32,
        precision=lax.Precision.HIGHEST,
    )


# ----------------------------- parameter building -----------------------------

def init_categorical_embedder_params(key, hidden, categories):
    """Per-category tables (nn.Embedding default init: N(0,1)) plus the stacked,
    MXU/lane-padded flat table + per-category row offsets used by the kernel."""
    num_cat = len(categories)
    keys = jax.random.split(key, num_cat)
    tables = [jax.random.normal(keys[i], (categories[i] + 1, hidden), jnp.float32)
              for i in range(num_cat)]

    sizes = [cat + 1 for cat in categories]
    offsets = np.concatenate([[0], np.cumsum(sizes)[:-1]]).astype(np.int32)

    flat = jnp.concatenate(tables, axis=0)                        # (R, H)
    R, H = flat.shape
    Rp = _round_up(max(R, 256), 256)      # one-hot contraction: whole MXU tiles
    Hp = _round_up(max(H, 128), 128)      # lane-dense output rows
    flat_padded = jnp.zeros((Rp, Hp), jnp.float32).at[:R, :H].set(flat)

    params = {"table": flat_padded, "offsets": jnp.asarray(offsets, jnp.int32)}
    return tables, params


# -------------------------------- forward pass --------------------------------

def categorical_embedder_forward(params, X_categorical, hidden):
    table = params["table"]                   # (Rp, Hp) f32
    offsets = params["offsets"]               # (C,)     i32
    B, C = X_categorical.shape
    Rp, Hp = table.shape
    N = B * C

    # Fold per-category offsets into the indices -> one flat gather, one kernel.
    flat_idx = (X_categorical.astype(jnp.int32) + offsets[None, :]).reshape(N, 1)

    # Block over the flattened row dimension (sublane-aligned).
    block_n = min(1024, _round_up(N, 8))
    grid = (pl.cdiv(N, block_n),)

    # Explicit VMEM budget: resident table + double-buffered idx/out blocks +
    # the one-hot intermediate, with headroom; capped for v7x's 64 MiB VMEM.
    table_bytes = Rp * Hp * 4
    io_bytes = 2 * (block_n * Hp * 4) + 2 * (block_n * 4)
    onehot_bytes = block_n * Rp * 4
    vmem_limit = table_bytes + io_bytes + onehot_bytes + (8 << 20)
    vmem_limit = int(min(max(vmem_limit, 32 << 20), 64 << 20))

    out = pl.pallas_call(
        embedder_kernel,
        out_shape=jax.ShapeDtypeStruct((N, Hp), jnp.float32),
        grid=grid,
        in_specs=[
            pl.BlockSpec((block_n, 1), lambda i: (i, 0)),    # flat indices
            pl.BlockSpec((Rp, Hp), lambda i: (0, 0)),        # resident table
        ],
        out_specs=pl.BlockSpec((block_n, Hp), lambda i: (i, 0)),
        compiler_params=pltpu.CompilerParams(
            dimension_semantics=("parallel",),               # v7x: 2 TCs
            vmem_limit_bytes=vmem_limit,
        ),
    )(flat_idx, table)

    out = out.reshape(B, C, Hp)
    if Hp != hidden:
        out = out[..., :hidden]
    return out


# ----------------------------- pure-JAX reference ------------------------------

def categorical_embedder_ref(tables, X_categorical):
    embs = [jnp.take(tables[i], X_categorical[:, i], axis=0)[:, None, :]
            for i in range(len(tables))]
    return jnp.concatenate(embs, axis=1)      # (B, C, H)


# ------------------------------------ main -------------------------------------

if __name__ == "__main__":
    B = 2
    H = 32
    categories = [3, 5, 4]
    C = len(categories)

    key = jax.random.PRNGKey(0)
    k_tab, k_x = jax.random.split(key)
    tables, params = init_categorical_embedder_params(k_tab, H, categories)

    # X_categorical[:, i] in [0, cat_i]  (table i has cat_i + 1 rows)
    xkeys = jax.random.split(k_x, C)
    cols = [jax.random.randint(xkeys[i], (B, 1), 0, categories[i] + 1, dtype=jnp.int32)
            for i in range(C)]
    X_categorical = jnp.concatenate(cols, axis=1)                # (B, C)

    out = categorical_embedder_forward(params, X_categorical, H)
    out = jax.block_until_ready(out)

    ref = categorical_embedder_ref(tables, X_categorical)
    assert out.shape == (B, C, H)
    np.testing.assert_allclose(np.asarray(out), np.asarray(ref), rtol=1e-6, atol=1e-6)

    print("KERNEL_OK")
</pallas_src>

<mosaic_0001>
module attributes {stable_mosaic.version = 11 : i64} {
  func.func @embedder_kernel(%arg0: i32, %arg1: memref<8x1xi32, #tpu.memory_space<vmem>>, %arg2: memref<256x128xf32, #tpu.memory_space<vmem>>, %arg3: memref<8x128xf32, #tpu.memory_space<vmem>>) attributes {dimension_semantics = [#tpu.dimension_semantics<parallel>], iteration_bounds = array<i64: 1>, scalar_prefetch = 0 : i64, scratch_operands = 0 : i64, tpu.core_type = #tpu.core_type<tc>, window_params = [{transform_indices = @transform_0, window_bounds = array<i64: 8, 1>}, {pipeline_mode = #tpu.pipeline_mode<synchronous>, transform_indices = @transform_1, window_bounds = array<i64: 256, 128>}, {transform_indices = @transform_2, window_bounds = array<i64: 8, 128>}]} {
    %c0 = arith.constant 0 : index
    %c0_0 = arith.constant 0 : index
    %0 = vector.load %arg1[%c0, %c0_0] : memref<8x1xi32, #tpu.memory_space<vmem>>, vector<8x1xi32>
    %1 = tpu.iota {dimensions = array<i32: 1>} : vector<8x256xi32>
    %2 = vector.broadcast %0 : vector<8x1xi32> to vector<8x256xi32>
    %3 = arith.cmpi eq, %1, %2 : vector<8x256xi32>
    %4 = arith.extui %3 : vector<8x256xi1> to vector<8x256xi32>
    %5 = arith.sitofp %4 : vector<8x256xi32> to vector<8x256xf32>
    %c0_1 = arith.constant 0 : index
    %c0_2 = arith.constant 0 : index
    %6 = vector.load %arg2[%c0_1, %c0_2] : memref<256x128xf32, #tpu.memory_space<vmem>>, vector<256x128xf32>
    %cst = arith.constant dense<0.000000e+00> : vector<8x128xf32>
    %7 = tpu.matmul %5, %6, %cst {dimension_numbers = #tpu.dot_dimension_numbers<[1], [0], [0], [1], [0, 0, 1, 1], [], []>, precision = #tpu.contract_precision<fp32>} : vector<8x256xf32>, vector<256x128xf32>, vector<8x128xf32> -> vector<8x128xf32>
    %c0_3 = arith.constant 0 : index
    %c0_4 = arith.constant 0 : index
    %8 = vector.load %arg3[%c0_3, %c0_4] : memref<8x128xf32, #tpu.memory_space<vmem>>, vector<8x128xf32>
    tpu.vector_store %arg3[%c0_3, %c0_4], %7 {strides = array<i32>} : memref<8x128xf32, #tpu.memory_space<vmem>>, vector<8x128xf32>,
    return
  }
  func.func @transform_0(%arg0: i32) -> (i32, i32) {
    %c0_i32 = arith.constant 0 : i32
    %c0_i32_0 = arith.constant 0 : i32
    return %arg0, %c0_i32 : i32, i32
  }
  func.func @transform_1(%arg0: i32) -> (i32, i32) {
    %c0_i32 = arith.constant 0 : i32
    %c0_i32_0 = arith.constant 0 : i32
    %c0_i32_1 = arith.constant 0 : i32
    return %c0_i32, %c0_i32_0 : i32, i32
  }
  func.func @transform_2(%arg0: i32) -> (i32, i32) {
    %c0_i32 = arith.constant 0 : i32
    %c0_i32_0 = arith.constant 0 : i32
    return %arg0, %c0_i32 : i32, i32
  }
}

</mosaic_0001>

<bundles_post_ra>
// kernel: tpu_custom_call.1
= control target key start
LH: loop header
LB: loop body
LE: loop exit
PB: predicated region body
PF: predicated region fallthrough
CT: control target
= control target key end

     0   :  { %7 = vsyncpa [#allocation3], 0  ;;  %s1394_s0 = inlined_call_operand.vmem [shape: s32[6,1], index: 0, kind: input, shape index: {}]   ;;  %s1395_s1 = inlined_call_operand.hbm [shape: f32[256,128], index: 1, kind: input, shape index: {}]   ;;  %s1396_s2 = inlined_call_operand.hbm [shape: f32[6,128], index: 2, kind: output, shape index: {}]  }
   0x1   :  { %8 = vsyncpa [#allocation4], 0  ;;  %s15_s11 = sshll.u32 %s1395_s1, 4  ;;  %s841_s12 = smov [#allocation2]   ;;  %s16_s11 = int_to_ptr.hbm [resolvable:$true] %s15_s11 }
   0x2   :  { %s17_s13 = sshll.u32 %s841_s12, 4  ;;  %s842_s14 = smov 128   ;;  %s18_s13 = int_to_ptr.vmem [resolvable:$true] %s17_s13 }
   0x3   :  { %s843_s15 = smov 8  }
   0x4   :  { %23 = dma.hbm_to_vmem [thread:$0]  %s16_s11, 4096, %s18_s13, [#allocation3], %s842_s14, %s842_s14, %s843_s15  }
   0x5   :  { %837 = dma.done.wait [#allocation3], 4096  }
   0x6   :  { %838 = vsyncadd [#allocation3], 4294963200  ;;  %v844_v0 = vmov 0   ;;  %v28_v1 = vld [vmem:[%s1394_s0] sm:$0xff]  ;;  %v56_v2 = vld [vmem:[#allocation2 + $0x78] sm:$0xff]  ;;  %s847_s0 = smov [#allocation5]  }
   0x7   :  { %788 = vset.pattern.permute.xlu0 %v844_v0  ;;  %v55_v3 = vld [vmem:[#allocation2 + $0x70] sm:$0xff]  ;;  %v869_v4 = vand.u32 4294901760, %v56_v2  ;;  %v54_v6 = vld [vmem:[#allocation2 + $0x68] sm:$0xff]  ;;  %v53_v7 = vld [vmem:[#allocation2 + $0x60] sm:$0xff]  ;;  %s761_s1 = sshll.u32 %s847_s0, 4  ;;  %s763_s20 = sshll.u32 %s1396_s2, 4  ;;  %s762_s1 = int_to_ptr.vmem [resolvable:$true] %s761_s1  ;;  %s764_s20 = int_to_ptr.hbm [resolvable:$true] %s763_s20 }
   0x8   :  { %33 = vperm.xlu0 %788, %v28_v1   ;;  %v871_v5 = vand.u32 4294901760, %v55_v3  ;;  %v52_v8 = vld [vmem:[#allocation2 + $0x58] sm:$0xff]  ;;  %v873_v9 = vand.u32 4294901760, %v54_v6  ;;  %v875_v10 = vand.u32 4294901760, %v53_v7  ;;  %v51_v12 = vld [vmem:[#allocation2 + $0x50] sm:$0xff]  ;;  %v50_v13 = vld [vmem:[#allocation2 + $0x48] sm:$0xff] }
   0x9   :  { %v877_v11 = vand.u32 4294901760, %v52_v8  ;;  %v49_v14 = vld [vmem:[#allocation2 + $0x40] sm:$0xff]  ;;  %v880_v15 = vsub.f32 %v56_v2, %v869_v4  ;;  %270 = vmatpush.msra.mxu3 %v869_v4  ;;  %74 = vmatpush.msra.mxu0 %v869_v4  ;;  %v887_v17 = vand.u32 4294901760, %v51_v12  ;;  %v889_v18 = vand.u32 4294901760, %v50_v13  ;;  %v48_v35 = vld [vmem:[#allocation2 + $0x38] sm:$0xff]  ;;  %v47_v36 = vld [vmem:[#allocation2 + $0x30] sm:$0xff] }
   0xa   :  { %v883_v16 = vsub.f32 %v55_v3, %v871_v5  ;;  %v892_v19 = vsub.f32 %v54_v6, %v873_v9  ;;  %v895_v20 = vsub.f32 %v53_v7, %v875_v10  ;;  %v900_v22 = vand.u32 4294901760, %v49_v14  ;;  %v46_v40 = vld [vmem:[#allocation2 + $0x28] sm:$0xff]  ;;  %v45_v42 = vld [vmem:[#allocation2 + $0x20] sm:$0xff]  ;;  %v44_v47 = vld [vmem:[#allocation2 + $0x18] sm:$0xff] }
   0xb   :  { %v898_v21 = vsub.f32 %v52_v8, %v877_v11  ;;  %v1411_v23 = vand.u32 4294901760, %v880_v15  ;;  %217 = vmatpush.msra.mxu2 %v880_v15  ;;  %272 = vmatpush.msra.mxu3 %v871_v5  ;;  %v907_v25 = vsub.f32 %v51_v12, %v887_v17  ;;  %v913_v28 = vsub.f32 %v50_v13, %v889_v18  ;;  %v43_v55 = vld [vmem:[#allocation2 + $0x10] sm:$0xff]  ;;  %v42_v61 = vld [vmem:[#allocation2 + $0x8] sm:$0xff]  ;;  %v41_v3 = vld [vmem:[#allocation2] sm:$0xff] }
   0xc   :  { %v1410_v24 = vand.u32 4294901760, %v883_v16  ;;  %v1409_v26 = vand.u32 4294901760, %v892_v19  ;;  %v1406_v27 = vand.u32 4294901760, %v895_v20  ;;  %76 = vmatpush.msra.mxu0 %v871_v5  ;;  %v930_v34 = vsub.f32 %v49_v14, %v900_v22  ;;  %v72_v12 = vld [vmem:[#allocation2 + $0xf8] sm:$0xff]  ;;  %v71_v13 = vld [vmem:[#allocation2 + $0xf0] sm:$0xff] }
   0xd   :  { %v117_v29 = vsub.f32 %v880_v15, %v1411_v23  ;;  %220 = vmatpush.msra.mxu2 %v883_v16  ;;  %v1405_v31 = vand.u32 4294901760, %v898_v21  ;;  %274 = vmatpush.msra.mxu3 %v873_v9  ;;  %v1404_v33 = vand.u32 4294901760, %v907_v25  ;;  %v1402_v41 = vand.u32 4294901760, %v913_v28 }
   0xe   :  { %v123_v30 = vsub.f32 %v883_v16, %v1410_v24  ;;  %v129_v32 = vsub.f32 %v892_v19, %v1409_v26  ;;  %78 = vmatpush.msra.mxu0 %v873_v9  ;;  %v135_v39 = vsub.f32 %v895_v20, %v1406_v27  ;;  %v943_v45 = vand.u32 4294901760, %v48_v35 }
   0xf   :  { %v118_v37 = vand.u32 4294901760, %v117_v29  ;;  %223 = vmatpush.msra.mxu2 %v892_v19  ;;  %276 = vmatpush.msra.mxu3 %v875_v10  ;;  %v141_v44 = vsub.f32 %v898_v21, %v1405_v31  ;;  %v945_v46 = vand.u32 4294901760, %v47_v36  ;;  %v147_v48 = vsub.f32 %v907_v25, %v1404_v33 }
  0x10   :  { %v124_v38 = vand.u32 4294901760, %v123_v30  ;;  %80 = vmatpush.msra.mxu0 %v875_v10  ;;  %v130_v43 = vand.u32 4294901760, %v129_v32  ;;  %v1401_v49 = vand.u32 4294901760, %v930_v34  ;;  %v953_v50 = vand.u32 4294901760, %v46_v40  ;;  %v70_v30 = vld [vmem:[#allocation2 + $0xe8] sm:$0xff] }
  0x11   :  { %119 = vmatpush.msra.mxu1 %v118_v37  ;;  %226 = vmatpush.msra.mxu2 %v895_v20  ;;  %v136_v51 = vand.u32 4294901760, %v135_v39  ;;  %v957_v52 = vsub.f32 %v48_v35, %v943_v45  ;;  %v960_v53 = vsub.f32 %v47_v36, %v945_v46  ;;  %v962_v54 = vand.u32 4294901760, %v45_v42  ;;  %v69_v37 = vld [vmem:[#allocation2 + $0xe0] sm:$0xff] }
  0x12   :  { %278 = vmatpush.msra.mxu3 %v877_v11  ;;  %82 = vmatpush.msra.mxu0 %v877_v11  ;;  %v967_v56 = vsub.f32 %v46_v40, %v953_v50  ;;  %v969_v57 = vand.u32 4294901760, %v44_v47  ;;  %v142_v58 = vand.u32 4294901760, %v141_v44  ;;  %v153_v59 = vsub.f32 %v913_v28, %v1402_v41 }
  0x13   :  { %125 = vmatpush.msra.mxu1 %v124_v38  ;;  %229 = vmatpush.msra.mxu2 %v898_v21  ;;  %v1400_v60 = vand.u32 4294901760, %v957_v52  ;;  %v159_v62 = vsub.f32 %v930_v34, %v1401_v49  ;;  %v981_v63 = vand.u32 4294901760, %v43_v55  ;;  %v148_v0 = vand.u32 4294901760, %v147_v48 }
  0x14   :  { %280 = vmatpush.msra.mxu3 %v887_v17  ;;  %84 = vmatpush.msra.mxu0 %v887_v17  ;;  %v1398_v1 = vand.u32 4294901760, %v960_v53  ;;  %v986_v2 = vsub.f32 %v45_v42, %v962_v54  ;;  %v1397_v6 = vand.u32 4294901760, %v967_v56  ;;  %v992_v7 = vsub.f32 %v44_v47, %v969_v57 }
  0x15   :  { %131 = vmatpush.msra.mxu1 %v130_v43  ;;  %232 = vmatpush.msra.mxu2 %v907_v25  ;;  %v994_v8 = vand.u32 4294901760, %v42_v61  ;;  %v154_v14 = vand.u32 4294901760, %v153_v59  ;;  %v165_v29 = vsub.f32 %v957_v52, %v1400_v60  ;;  %v160_v32 = vand.u32 4294901760, %v159_v62  ;;  %v68_v43 = vld [vmem:[#allocation2 + $0xd8] sm:$0xff] }
  0x16   :  { %282 = vmatpush.msra.mxu3 %v889_v18  ;;  %86 = vmatpush.msra.mxu0 %v889_v18  ;;  %v1003_v35 = vsub.f32 %v43_v55, %v981_v63  ;;  %v1005_v36 = vand.u32 4294901760, %v41_v3  ;;  %v171_v38 = vsub.f32 %v960_v53, %v1398_v1  ;;  %v1399_v39 = vand.u32 4294901760, %v986_v2 }
  0x17   :  { %137 = vmatpush.msra.mxu1 %v136_v51  ;;  %235 = vmatpush.msra.mxu2 %v913_v28  ;;  %v1012_v40 = vand.u32 4294901760, %v72_v12  ;;  %v1014_v42 = vand.u32 4294901760, %v71_v13  ;;  %v177_v44 = vsub.f32 %v967_v56, %v1397_v6  ;;  %v1403_v47 = vand.u32 4294901760, %v992_v7 }
  0x18   :  { %284 = vmatpush.msra.mxu3 %v900_v22  ;;  %88 = vmatpush.msra.mxu0 %v900_v22  ;;  %1425 = vst [vmem:[#allocation8_spill] sm:$0xff] %v1005_v36  ;;  %v1023_v48 = vsub.f32 %v42_v61, %v994_v8  ;;  %v1025_v51 = vand.u32 4294901760, %v70_v30  ;;  %v166_v55 = vand.u32 4294901760, %v165_v29  ;;  %v1034_v62 = vand.u32 4294901760, %v69_v37 }
  0x19   :  { %143 = vmatpush.msra.mxu1 %v142_v58  ;;  %238 = vmatpush.msra.mxu2 %v930_v34  ;;  %v1029_v58 = vsub.f32 %v72_v12, %v1012_v40  ;;  %v1032_v59 = vsub.f32 %v71_v13, %v1014_v42  ;;  %v1039_v61 = vsub.f32 %v41_v3, %v1005_v36  ;;  %v1044_v29 = vand.u32 4294901760, %v68_v43 }
  0x1a   :  { %286 = vmatpush.msra.mxu3 %v943_v45  ;;  %90 = vmatpush.msra.mxu0 %v943_v45  ;;  %v172_v12 = vand.u32 4294901760, %v171_v38  ;;  %v183_v13 = vsub.f32 %v986_v2, %v1399_v39  ;;  %v1408_v6 = vand.u32 4294901760, %v1003_v35  ;;  %v178_v38 = vand.u32 4294901760, %v177_v44 }
  0x1b   :  { %149 = vmatpush.msra.mxu1 %v148_v0  ;;  %241 = vmatpush.msra.mxu2 %v957_v52  ;;  %1426 = vst [vmem:[#allocation9_spill] sm:$0xff] %v1029_v58  ;;  %v67_v0 = vld [vmem:[#allocation2 + $0xd0] sm:$0xff]  ;;  %v1407_v1 = vand.u32 4294901760, %v1029_v58  ;;  %v1412_v3 = vand.u32 4294901760, %v1032_v59  ;;  %v189_v39 = vsub.f32 %v992_v7, %v1403_v47  ;;  %v1413_v60 = vand.u32 4294901760, %v1023_v48  ;;  %v65_v47 = vld [vmem:[#allocation2 + $0xc0] sm:$0xff] }
  0x1c   :  { %288 = vmatpush.msra.mxu3 %v945_v46  ;;  %92 = vmatpush.msra.mxu0 %v945_v46  ;;  %1427 = vst [vmem:[#allocation10_spill] sm:$0xff] %v1032_v59  ;;  %v1063_v49 = vsub.f32 %v69_v37, %v1034_v62  ;;  %v1072_v41 = vsub.f32 %v68_v43, %v1044_v29  ;;  %v184_v33 = vand.u32 4294901760, %v183_v13  ;;  %v1417_v31 = vand.u32 4294901760, %v1039_v61  ;;  %v64_v13 = vld [vmem:[#allocation2 + $0xb8] sm:$0xff] }
  0x1d   :  { %155 = vmatpush.msra.mxu1 %v154_v14  ;;  %244 = vmatpush.msra.mxu2 %v960_v53  ;;  %v1042_v14 = vsub.f32 %v70_v30, %v1025_v51  ;;  %v1055_v30 = vand.u32 4294901760, %v67_v0  ;;  %v195_v37 = vsub.f32 %v1003_v35, %v1408_v6  ;;  %v464_v43 = vsub.f32 %v1032_v59, %v1412_v3 }
  0x1e   :  { %290 = vmatpush.msra.mxu3 %v953_v50  ;;  %94 = vmatpush.msra.mxu0 %v953_v50  ;;  %1429 = vst [vmem:[#allocation12_spill] sm:$0xff] %v1063_v49  ;;  %v201_v6 = vsub.f32 %v1023_v48, %v1413_v60  ;;  %v1094_v24 = vand.u32 4294901760, %v65_v47  ;;  %v207_v60 = vsub.f32 %v1039_v61, %v1417_v31  ;;  %v1430_v31 = vand.u32 4294901760, %v1063_v49 }
  0x1f   :  { %1428 = vst [vmem:[#allocation11_spill] sm:$0xff] %v1042_v14  ;;  %161 = vmatpush.msra.mxu1 %v160_v32  ;;  %247 = vmatpush.msra.mxu2 %v967_v56  ;;  %v66_v32 = vld [vmem:[#allocation2 + $0xc8] sm:$0xff]  ;;  %v1416_v44 = vand.u32 4294901760, %v1042_v14  ;;  %v196_v3 = vand.u32 4294901760, %v195_v37  ;;  %v465_v59 = vand.u32 4294901760, %v464_v43 }
  0x20   :  { %292 = vmatpush.msra.mxu3 %v962_v54  ;;  %96 = vmatpush.msra.mxu0 %v962_v54  ;;  %v1079_v27 = vand.u32 4294901760, %v66_v32  ;;  %v202_v37 = vand.u32 4294901760, %v201_v6  ;;  %v61_v6 = vld [vmem:[#allocation2 + $0xa0] sm:$0xff] }
  0x21   :  { %167 = vmatpush.msra.mxu1 %v166_v55  ;;  %250 = vmatpush.msra.mxu2 %v986_v2  ;;  %v458_v55 = vsub.f32 %v1029_v58, %v1407_v1  ;;  %v190_v1 = vand.u32 4294901760, %v189_v39  ;;  %v476_v39 = vsub.f32 %v1063_v49, %v1430_v31  ;;  %v208_v58 = vand.u32 4294901760, %v207_v60 }
  0x22   :  { %294 = vmatpush.msra.mxu3 %v969_v57  ;;  %98 = vmatpush.msra.mxu0 %v969_v57  ;;  %v1107_v26 = vsub.f32 %v66_v32, %v1079_v27  ;;  %v1119_v32 = vsub.f32 %v65_v47, %v1094_v24  ;;  %v1434_v60 = vand.u32 4294901760, %v883_v16 }
  0x23   :  { %173 = vmatpush.msra.mxu1 %v172_v12  ;;  %253 = vmatpush.msra.mxu2 %v992_v7  ;;  %v1087_v12 = vsub.f32 %v67_v0, %v1055_v30  ;;  %v459_v23 = vand.u32 4294901760, %v458_v55  ;;  %v470_v0 = vsub.f32 %v1042_v14, %v1416_v44  ;;  %v1109_v55 = vand.u32 4294901760, %v64_v13 }
  0x24   :  { %296 = vmatpush.msra.mxu3 %v981_v63  ;;  %100 = vmatpush.msra.mxu0 %v981_v63  ;;  %v1431_v44 = vand.u32 4294901760, %v1072_v41  ;;  %v493_v31 = vand.u32 4294901760, %v1107_v26 }
  0x25   :  { %179 = vmatpush.msra.mxu1 %v178_v38  ;;  %256 = vmatpush.msra.mxu2 %v1003_v35  ;;  %v63_v38 = vld [vmem:[#allocation2 + $0xb0] sm:$0xff]  ;;  %v471_v43 = vand.u32 4294901760, %v470_v0  ;;  %v1131_v47 = vsub.f32 %v64_v13, %v1109_v55  ;;  %v60_v0 = vld [vmem:[#allocation2 + $0x98] sm:$0xff]  ;;  %v1145_v13 = vand.u32 4294901760, %v61_v6 }
  0x26   :  { %298 = vmatpush.msra.mxu3 %v994_v8  ;;  %102 = vmatpush.msra.mxu0 %v994_v8  ;;  %v1121_v14 = vand.u32 4294901760, %v63_v38  ;;  %v494_v16 = vsub.f32 %v1107_v26, %v493_v31 }
  0x27   :  { %185 = vmatpush.msra.mxu1 %v184_v33  ;;  %259 = vmatpush.msra.mxu2 %v1023_v48  ;;  %v62_v33 = vld [vmem:[#allocation2 + $0xa8] sm:$0xff] }
  0x28   :  { %300 = vmatpush.msra.mxu3 %v1005_v36  ;;  %104 = vmatpush.msra.mxu0 %v1005_v36  ;;  %v1432_v36 = vand.u32 4294901760, %v880_v15  ;;  %v1133_v49 = vand.u32 4294901760, %v62_v33  ;;  %v477_v15 = vand.u32 4294901760, %v476_v39  ;;  %v505_v39 = vand.u32 4294901760, %v1131_v47 }
  0x29   :  { %191 = vmatpush.msra.mxu1 %v190_v1  ;;  %262 = vmatpush.msra.mxu2 %v1039_v61  ;;  %v482_v1 = vsub.f32 %v1072_v41, %v1431_v44 }
  0x2a   :  { %460 = vmatpush.msrb.mxu3 %v459_v23  ;;  %311 = vmatpush.msrb.mxu0 %v1432_v36  ;;  %v1433_v23 = vand.u32 4294901760, %v1087_v12  ;;  %v499_v36 = vand.u32 4294901760, %v1119_v32 }
  0x2b   :  { %415 = vmatpush.msrb.mxu2 %v1012_v40  ;;  %197 = vmatpush.msra.mxu1 %v196_v3  ;;  %v1143_v3 = vsub.f32 %v63_v38, %v1121_v14  ;;  %v1157_v38 = vand.u32 4294901760, %v60_v0 }
  0x2c   :  { %466 = vmatpush.msrb.mxu3 %v465_v59  ;;  %v488_v44 = vsub.f32 %v1087_v12, %v1433_v23  ;;  %315 = vmatpush.msrb.mxu0 %v1434_v60  ;;  %v483_v59 = vand.u32 4294901760, %v482_v1  ;;  %v1435_v23 = vand.u32 4294901760, %v892_v19 }
  0x2d   :  { %417 = vmatpush.msrb.mxu2 %v1014_v42  ;;  %203 = vmatpush.msra.mxu1 %v202_v37  ;;  %v1155_v37 = vsub.f32 %v62_v33, %v1133_v49  ;;  %v511_v1 = vand.u32 4294901760, %v1143_v3  ;;  %v1168_v33 = vsub.f32 %v61_v6, %v1145_v13 }
  0x2e   :  { %472 = vmatpush.msrb.mxu3 %v471_v43  ;;  %319 = vmatpush.msrb.mxu0 %v1435_v23  ;;  %v489_v19 = vand.u32 4294901760, %v488_v44  ;;  %v500_v43 = vsub.f32 %v1119_v32, %v499_v36  ;;  %v506_v44 = vsub.f32 %v1131_v47, %v505_v39 }
  0x2f   :  { %419 = vmatpush.msrb.mxu2 %v1025_v51  ;;  %209 = vmatpush.msra.mxu1 %v208_v58  ;;  %v1436_v58 = vand.u32 4294901760, %v895_v20  ;;  %v495_v20 = vand.u32 4294901760, %v494_v16  ;;  %v517_v60 = vand.u32 4294901760, %v1155_v37  ;;  %v512_v6 = vsub.f32 %v1143_v3, %v511_v1 }
  0x30   :  { %478 = vmatpush.msrb.mxu3 %v477_v15  ;;  %v1179_v15 = vsub.f32 %v60_v0, %v1157_v38  ;;  %v507_v0 = vand.u32 4294901760, %v506_v44 }
  0x31   :  { %378 = vmatpush.msrb.mxu1 %v869_v4  ;;  %421 = vmatpush.msrb.mxu2 %v1034_v62  ;;  %v1437_v4 = vand.u32 4294901760, %v898_v21  ;;  %v501_v21 = vand.u32 4294901760, %v500_v43  ;;  %v513_v16 = vand.u32 4294901760, %v512_v6  ;;  %v59_v43 = vld [vmem:[#allocation2 + $0x90] sm:$0xff] }
  0x32   :  { %323 = vmatpush.msrb.mxu0 %v1436_v58  ;;  %484 = vmatpush.msrb.mxu3 %v483_v59  ;;  %v523_v59 = vand.u32 4294901760, %v1168_v33  ;;  %v529_v23 = vand.u32 4294901760, %v1179_v15  ;;  %v1441_v58 = vand.u32 4294901760, %v957_v52  ;;  %v1443_v52 = vand.u32 4294901760, %v967_v56 }
  0x33   :  { %380 = vmatpush.msrb.mxu1 %v871_v5  ;;  %423 = vmatpush.msrb.mxu2 %v1044_v29  ;;  %v1438_v5 = vand.u32 4294901760, %v907_v25  ;;  %v518_v25 = vsub.f32 %v1155_v37, %v517_v60  ;;  %v1447_v56 = vand.u32 4294901760, %v1023_v48 }
  0x34   :  { %327 = vmatpush.msrb.mxu0 %v1437_v4  ;;  %490 = vmatpush.msrb.mxu3 %v489_v19  ;;  %v530_v19 = vsub.f32 %v1179_v15, %v529_v23 }
  0x35   :  { %382 = vmatpush.msrb.mxu1 %v873_v9  ;;  %425 = vmatpush.msrb.mxu2 %v1055_v30  ;;  %v1439_v9 = vand.u32 4294901760, %v913_v28  ;;  %v524_v28 = vsub.f32 %v1168_v33, %v523_v59 }
  0x36   :  { %331 = vmatpush.msrb.mxu0 %v1438_v5  ;;  %496 = vmatpush.msrb.mxu3 %v495_v20  ;;  %v531_v4 = vand.u32 4294901760, %v530_v19  ;;  %v846_v19 = vmov 1.0  }
  0x37   :  { %384 = vmatpush.msrb.mxu1 %v875_v10  ;;  %427 = vmatpush.msrb.mxu2 %v1079_v27  ;;  %v1440_v10 = vand.u32 4294901760, %v930_v34  ;;  %v1442_v34 = vand.u32 4294901760, %v960_v53  ;;  %v1445_v53 = vand.u32 4294901760, %v992_v7 }
  0x38   :  { %335 = vmatpush.msrb.mxu0 %v1439_v9  ;;  %502 = vmatpush.msrb.mxu3 %v501_v21 }
  0x39   :  { %386 = vmatpush.msrb.mxu1 %v877_v11  ;;  %429 = vmatpush.msrb.mxu2 %v1094_v24  ;;  %v519_v11 = vand.u32 4294901760, %v518_v25  ;;  %v29_v25 = vlaneseq }
  0x3a   :  { %339 = vmatpush.msrb.mxu0 %v1440_v10  ;;  %508 = vmatpush.msrb.mxu3 %v507_v0 }
  0x3b   :  { %388 = vmatpush.msrb.mxu1 %v887_v17  ;;  %431 = vmatpush.msrb.mxu2 %v1109_v55  ;;  %v525_v17 = vand.u32 4294901760, %v524_v28  ;;  %v30_v10 = vand.u32 127, %v29_v25 }
  0x3c   :  { %343 = vmatpush.msrb.mxu0 %v1441_v58  ;;  %514 = vmatpush.msrb.mxu3 %v513_v16  ;;  %v845_v58 = vmov 0.0  }
  0x3d   :  { %390 = vmatpush.msrb.mxu1 %v889_v18  ;;  %433 = vmatpush.msrb.mxu2 %v1121_v14  ;;  %v1444_v18 = vand.u32 4294901760, %v986_v2  ;;  %v58_v2 = vld [vmem:[#allocation2 + $0x88] sm:$0xff]  ;;  %v1269_v16 = vadd.s32 128, %v30_v10 }
  0x3e   :  { %347 = vmatpush.msrb.mxu0 %v1442_v34  ;;  %520 = vmatpush.msrb.mxu3 %v519_v11  ;;  %v1242_v7 = vand.u32 4294901760, %v58_v2 }
  0x3f   :  { %392 = vmatpush.msrb.mxu1 %v900_v22  ;;  %435 = vmatpush.msrb.mxu2 %v1133_v49  ;;  %v1225_v22 = vand.u32 4294901760, %v59_v43 }
  0x40   :  { %351 = vmatpush.msrb.mxu0 %v1443_v52  ;;  %526 = vmatpush.msrb.mxu3 %v525_v17 }
  0x41   :  { %394 = vmatpush.msrb.mxu1 %v943_v45  ;;  %437 = vmatpush.msrb.mxu2 %v1145_v13  ;;  %v1446_v45 = vand.u32 4294901760, %v1003_v35  ;;  %v1245_v35 = vsub.f32 %v59_v43, %v1225_v22 }
  0x42   :  { %355 = vmatpush.msrb.mxu0 %v1444_v18  ;;  %532 = vmatpush.msrb.mxu3 %v531_v4  ;;  %v1450_v18 = vld [vmem:[#allocation9_spill] sm:$0xff] }
  0x43   :  { %396 = vmatpush.msrb.mxu1 %v945_v46  ;;  %439 = vmatpush.msrb.mxu2 %v1157_v38  ;;  %v1448_v46 = vand.u32 4294901760, %v1039_v61  ;;  %v1252_v61 = vsub.f32 %v58_v2, %v1242_v7 }
  0x44   :  { %359 = vmatpush.msrb.mxu0 %v1445_v53  ;;  %v1451_v53 = vand.u32 4294901760, %v1450_v18 }
  0x45   :  { %398 = vmatpush.msrb.mxu1 %v953_v50  ;;  %441 = vmatpush.msrb.mxu2 %v1225_v22  ;;  %v1449_v50 = vld [vmem:[#allocation8_spill] sm:$0xff] }
  0x46   :  { %363 = vmatpush.msrb.mxu0 %v1446_v45 }
  0x47   :  { %400 = vmatpush.msrb.mxu1 %v962_v54  ;;  %443 = vmatpush.msrb.mxu2 %v1242_v7  ;;  %v535_v54 = vand.u32 4294901760, %v1245_v35 }
  0x48   :  { %367 = vmatpush.msrb.mxu0 %v1447_v56  ;;  %v1452_v56 = vld [vmem:[#allocation10_spill] sm:$0xff] }
  0x49   :  { %402 = vmatpush.msrb.mxu1 %v969_v57  ;;  %v57_v57 = vld [vmem:[#allocation2 + $0x80] sm:$0xff] }
  0x4a   :  { %371 = vmatpush.msrb.mxu0 %v1448_v46  ;;  %v1249_v48 = vand.u32 4294901760, %v57_v57  ;;  %v1453_v46 = vand.u32 4294901760, %v1452_v56 }
  0x4b   :  { %404 = vmatpush.msrb.mxu1 %v981_v63  ;;  %v536_v63 = vsub.f32 %v1245_v35, %v535_v54 }
  0x4c   :  { %445 = vmatpush.msrb.mxu2 %v1249_v48  ;;  %v1260_v20 = vsub.f32 %v57_v57, %v1249_v48  ;;  %v1454_v57 = vld [vmem:[#allocation11_spill] sm:$0xff] }
  0x4d   :  { %406 = vmatpush.msrb.mxu1 %v994_v8  ;;  %v541_v8 = vand.u32 4294901760, %v1252_v61  ;;  %v537_v44 = vand.u32 4294901760, %v536_v63  ;;  %v1455_v63 = vand.u32 4294901760, %v1454_v57 }
  0x4e   :  { %v547_v21 = vand.u32 4294901760, %v1260_v20 }
  0x4f   :  { %408 = vmatpush.msrb.mxu1 %v1449_v50  ;;  %v542_v5 = vsub.f32 %v1252_v61, %v541_v8  ;;  %538 = vmatpush.msrb.mxu3 %v537_v44  ;;  %v1456_v44 = vld [vmem:[#allocation12_spill] sm:$0xff] }
  0x50   :  { %v548_v9 = vsub.f32 %v1260_v20, %v547_v21 }
  0x51   :  { %v543_v6 = vand.u32 4294901760, %v542_v5  ;;  %v1457_v5 = vand.u32 4294901760, %v1456_v44 }
  0x52   :  { %v549_v0 = vand.u32 4294901760, %v548_v9 }
  0x53   :  { %544 = vmatpush.msrb.mxu3 %v543_v6 }
  0x55   :  { %550 = vmatpush.msrb.mxu3 %v549_v0 }
  0x7a   :  { %v1271_v28 = vpop.permute.xlu0 %33 }
  0x7b   :  { %vm35_vm0 = vcmp.eq.s32.totalorder %v30_v10, %v1271_v28  ;;  %vm36_vm1 = vcmp.eq.s32.totalorder %v1269_v16, %v1271_v28 }
  0x7c   :  { %v774_v11 = vsel %vm36_vm1, 1.0, %v845_v58  ;;  %775 = vmatmul.msk.f32.vlgmr.msra.gmra.mxu1 %vm35_vm0, %v846_v19  ;;  %v773_v34 = vsel %vm35_vm0, 1.0, %v845_v58 }
  0x7d   :  { %v1284_v17 = vsub.f32 %v774_v11, %v774_v11  ;;  %611 = vmatpush.msra.mxu1 %v1012_v40  ;;  %v106_v52 = vsub.f32 %v773_v34, %v773_v34 }
  0x7f   :  { %613 = vmatpush.msra.mxu1 %v1014_v42  ;;  %265 = vmatmul.f32.vlgmr.msra.gmra.mxu2 %v106_v52  ;;  %v107_v43 = vand.u32 4294901760, %v106_v52  ;;  %v448_v4 = vand.u32 4294901760, %v1284_v17 }
  0x80   :  { %652 = vmatpush.msra.mxu2 %v1451_v53 }
  0x81   :  { %615 = vmatpush.msra.mxu1 %v1025_v51  ;;  %304 = vmatmul.f32.vlgmr.msra.gmra.mxu3 %v107_v43  ;;  %v108_v45 = vsub.f32 %v106_v52, %v107_v43  ;;  %v449_v50 = vsub.f32 %v1284_v17, %v448_v4 }
  0x82   :  { %656 = vmatpush.msra.mxu2 %v1453_v46  ;;  %719 = vmatpush.msra.mxu3 %v1012_v40 }
  0x83   :  { %617 = vmatpush.msra.mxu1 %v1034_v62  ;;  %v109_v2 = vand.u32 4294901760, %v108_v45  ;;  %v450_v40 = vand.u32 4294901760, %v449_v50 }
  0x84   :  { %660 = vmatpush.msra.mxu2 %v1455_v63  ;;  %721 = vmatpush.msra.mxu3 %v1014_v42  ;;  %v1458_v42 = vand.u32 4294901760, %v1072_v41 }
  0x85   :  { %777 = vmatmul.msk.f32.vlgmr.msrb.gmra.mxu1 %vm35_vm0, %v846_v19  ;;  %110 = vmatmul.f32.vlgmr.msra.gmra.mxu0 %v109_v2 }
  0x86   :  { %619 = vmatpush.msra.mxu1 %v1044_v29  ;;  %558 = vmatpush.msra.mxu0 %v1450_v18 }
  0x87   :  { %664 = vmatpush.msra.mxu2 %v1457_v5  ;;  %723 = vmatpush.msra.mxu3 %v1025_v51  ;;  %v1459_v51 = vand.u32 4294901760, %v1087_v12 }
  0x88   :  { %621 = vmatpush.msra.mxu1 %v1055_v30  ;;  %451 = vmatmul.f32.vlgmr.msrb.gmra.mxu2 %v450_v40 }
  0x89   :  { %561 = vmatpush.msra.mxu0 %v1452_v56  ;;  %668 = vmatpush.msra.mxu2 %v1458_v42 }
  0x8a   :  { %725 = vmatpush.msra.mxu3 %v1034_v62  ;;  %623 = vmatpush.msra.mxu1 %v1079_v27 }
  0x8b   :  { %778 = vmatmul.msk.f32.vlgmr.msrb.gmra.mxu3 %vm36_vm1, %v846_v19  ;;  %564 = vmatpush.msra.mxu0 %v1454_v57 }
  0x8c   :  { %672 = vmatpush.msra.mxu2 %v1459_v51  ;;  %727 = vmatpush.msra.mxu3 %v1044_v29 }
  0x8d   :  { %625 = vmatpush.msra.mxu1 %v1094_v24  ;;  %567 = vmatpush.msra.mxu0 %v1456_v44 }
  0x8e   :  { %676 = vmatpush.msra.mxu2 %v493_v31  ;;  %729 = vmatpush.msra.mxu3 %v1055_v30 }
  0x8f   :  { %627 = vmatpush.msra.mxu1 %v1109_v55  ;;  %776 = vmatmul.msk.f32.vlgmr.msrb.gmra.mxu0 %vm35_vm0, %v846_v19 }
  0x90   :  { %570 = vmatpush.msra.mxu0 %v1072_v41  ;;  %680 = vmatpush.msra.mxu2 %v499_v36 }
  0x91   :  { %731 = vmatpush.msra.mxu3 %v1079_v27  ;;  %629 = vmatpush.msra.mxu1 %v1121_v14 }
  0x92   :  { %573 = vmatpush.msra.mxu0 %v1087_v12  ;;  %684 = vmatpush.msra.mxu2 %v505_v39 }
  0x93   :  { %733 = vmatpush.msra.mxu3 %v1094_v24  ;;  %631 = vmatpush.msra.mxu1 %v1133_v49 }
  0x94   :  { %576 = vmatpush.msra.mxu0 %v1107_v26  ;;  %688 = vmatpush.msra.mxu2 %v511_v1 }
  0x95   :  { %735 = vmatpush.msra.mxu3 %v1109_v55  ;;  %633 = vmatpush.msra.mxu1 %v1145_v13 }
  0x96   :  { %579 = vmatpush.msra.mxu0 %v1119_v32  ;;  %692 = vmatpush.msra.mxu2 %v517_v60 }
  0x97   :  { %737 = vmatpush.msra.mxu3 %v1121_v14  ;;  %635 = vmatpush.msra.mxu1 %v1157_v38 }
  0x98   :  { %582 = vmatpush.msra.mxu0 %v1131_v47  ;;  %696 = vmatpush.msra.mxu2 %v523_v59 }
  0x99   :  { %739 = vmatpush.msra.mxu3 %v1133_v49  ;;  %637 = vmatpush.msra.mxu1 %v1225_v22 }
  0x9a   :  { %585 = vmatpush.msra.mxu0 %v1143_v3  ;;  %700 = vmatpush.msra.mxu2 %v529_v23 }
  0x9b   :  { %741 = vmatpush.msra.mxu3 %v1145_v13  ;;  %639 = vmatpush.msra.mxu1 %v1242_v7 }
  0x9c   :  { %588 = vmatpush.msra.mxu0 %v1155_v37  ;;  %704 = vmatpush.msra.mxu2 %v535_v54 }
  0x9d   :  { %743 = vmatpush.msra.mxu3 %v1157_v38  ;;  %641 = vmatpush.msra.mxu1 %v1249_v48 }
  0x9e   :  { %591 = vmatpush.msra.mxu0 %v1168_v33  ;;  %645 = vmatmul.f32.vlgmr.msra.gmra.mxu1 %v448_v4 }
  0x9f   :  { %708 = vmatpush.msra.mxu2 %v541_v8  ;;  %745 = vmatpush.msra.mxu3 %v1225_v22 }
  0xa0   :  { %594 = vmatpush.msra.mxu0 %v1179_v15 }
  0xa1   :  { %712 = vmatpush.msra.mxu2 %v547_v21  ;;  %747 = vmatpush.msra.mxu3 %v1242_v7 }
  0xa2   :  { %779 = vmatmul.msk.f32.vlgmr.msra.gmra.mxu2 %vm36_vm1, %v846_v19  ;;  %597 = vmatpush.msra.mxu0 %v1245_v35 }
  0xa3   :  { %749 = vmatpush.msra.mxu3 %v1249_v48 }
  0xa4   :  { %780 = vmatmul.msk.f32.vlgmr.msra.gmra.mxu3 %vm36_vm1, %v846_v19  ;;  %600 = vmatpush.msra.mxu0 %v1252_v61 }
  0xa6   :  { %603 = vmatpush.msra.mxu0 %v1260_v20 }
  0xa7   :  { %606 = vmatmul.f32.vlgmr.msra.gmra.mxu0 %v1284_v17 }
  0xf9   :  { %v212_v26 = vpop.f32.mrf.mxu1 }
 0x102   :  { %v111_v24 = vpop.f32.mrf.mxu0  ;;  %v266_v41 = vpop.f32.mrf.mxu2 }
 0x103   :  { %v213_v27 = vadd.f32 %v212_v26, %v111_v24  ;;  %v411_v12 = vpop.f32.mrf.mxu1 }
 0x104   :  { %v305_v62 = vpop.f32.mrf.mxu3 }
 0x105   :  { %v267_v49 = vadd.f32 %v266_v41, %v213_v27 }
 0x107   :  { %v306_v29 = vadd.f32 %v305_v62, %v267_v49 }
 0x10b   :  { %v452_v32 = vpop.f32.mrf.mxu2 }
 0x10c   :  { %v374_v14 = vpop.f32.mrf.mxu0 }
 0x10d   :  { %v375_v30 = vadd.f32 %v374_v14, %v306_v29 }
 0x10e   :  { %v553_v47 = vpop.f32.mrf.mxu3 }
 0x10f   :  { %v412_v55 = vadd.f32 %v411_v12, %v375_v30 }
 0x111   :  { %v453_v31 = vadd.f32 %v452_v32, %v412_v55 }
 0x113   :  { %v554_v36 = vadd.f32 %v553_v47, %v453_v31 }
 0x11b   :  { %v646_v39 = vpop.f32.mrf.mxu1 }
 0x124   :  { %v607_v3 = vpop.f32.mrf.mxu0 }
 0x125   :  { %v608_v13 = vadd.f32 %v607_v3, %v554_v36  ;;  %v715_v38 = vpop.f32.mrf.mxu2 }
 0x127   :  { %v647_v37 = vadd.f32 %v646_v39, %v608_v13  ;;  %v752_v33 = vpop.f32.mrf.mxu3 }
 0x129   :  { %v716_v1 = vadd.f32 %v715_v38, %v647_v37 }
 0x12b   :  { %v753_v60 = vadd.f32 %v752_v33, %v716_v1 }
 0x12d   :  { %755 = vst [vmem:[#allocation5] sm:$0xff] %v753_v60 }
 0x12e   :  { %766 = dma.vmem_to_hbm [thread:$0]  %s762_s1, 128, %s764_s20, [#allocation4]  }
 0x12f   :  { %839 = dma.done.wait [#allocation4], 128  }
 0x130   :  { %840 = vsyncadd [#allocation4], 4294967168 }
 0x131   :  { %771 = vsyncpa [#allocation3], 1 }
 0x132   :  { %772 = vsyncpa [#allocation4], 1 }

</bundles_post_ra>
